<compile_context>
chip_gen: v6e
topology: v6e:2x2x1
jax: 0.10.0
libtpu: 0.0.40
codegen_flags: <defaults>
</compile_context>

<pallas_src>
import functools
import math

import numpy as np
import jax
import jax.numpy as jnp
from jax.experimental import pallas as pl
from jax.experimental.pallas import tpu as pltpu


# ----------------------------------------------------------------------------
# Kernel: one grid step handles `block_n` samples, full (C*k, H*W/k) per sample.
# ----------------------------------------------------------------------------
def rln_kernel(x_ref, wb_ref, meta_ref, out_ref, meta_out_ref, *, eps, inv_count):
    x = x_ref[...]                                   # (BN, CF, HWF), native dtype

    # One-pass moments over (CF, HWF), accumulated in f32 (lane reduce, then
    # sublane reduce).  NOTE: E[x^2] - mean^2 can cancel for inputs with a very
    # large |mean|/std ratio; f32 accumulation + clamp keeps it safe for
    # activation-scale inputs.
    s1 = jnp.sum(jnp.sum(x, axis=2, keepdims=True, dtype=jnp.float32),
                 axis=1, keepdims=True)              # (BN, 1, 1)
    s2 = jnp.sum(jnp.sum(x * x, axis=2, keepdims=True, dtype=jnp.float32),
                 axis=1, keepdims=True)              # (BN, 1, 1)
    mean = s1 * inv_count
    var = jnp.maximum(s2 * inv_count - mean * mean, 0.0)
    inv_std = jax.lax.rsqrt(var + eps)               # EUP slot
    std = (var + eps) * inv_std                      # == sqrt(var + eps)

    # Fused per-(sample, channel) affine: out = x * scale + shift (2 VPU ops/elem).
    w = wb_ref[0:1].astype(jnp.float32)              # (1, CF, 1)
    b = wb_ref[1:2].astype(jnp.float32)              # (1, CF, 1)
    scale = inv_std * w                              # (BN, CF, 1)
    shift = b - mean * scale                         # (BN, CF, 1)
    out_ref[...] = (x * scale.astype(x.dtype)
                    + shift.astype(x.dtype)).astype(out_ref.dtype)

    # meta1(std), meta2(mean): 1x1 convs on a (N,1,1,1) tensor == per-channel
    # affine of the per-sample scalar.  Emitted as one lane-concatenated store.
    std2 = std[:, 0, :]                              # (BN, 1)
    mean2 = mean[:, 0, :]                            # (BN, 1)
    m1w = meta_ref[0:1, :].astype(jnp.float32)       # (1, C)
    m1b = meta_ref[1:2, :].astype(jnp.float32)
    m2w = meta_ref[2:3, :].astype(jnp.float32)
    m2b = meta_ref[3:4, :].astype(jnp.float32)
    rescale = std2 * m1w + m1b                       # (BN, C)
    rebias = mean2 * m2w + m2b                       # (BN, C)
    meta_out_ref[...] = jnp.concatenate(
        [rescale, rebias], axis=1).astype(meta_out_ref.dtype)   # (BN, 2C)


# ----------------------------------------------------------------------------
# Tiling helpers.
# ----------------------------------------------------------------------------
def _fold_factor(c, hw):
    """Fold (C, HW) -> (C*k, HW/k) so the sublane dim is a multiple of 8 while
    keeping the lane dim a multiple of 128."""
    if c % 8 == 0:
        return 1
    k = 8 // math.gcd(c, 8)
    if hw % (k * 128) == 0:
        return k
    return 1


def _pick_block_n(n, per_sample_bytes, budget_bytes=24 * 1024 * 1024):
    bn = max(1, budget_bytes // max(per_sample_bytes, 1))
    if n >= 16:
        # v7x has 2 TensorCores: keep >= 2 grid steps to shard the parallel axis.
        bn = min(bn, (n + 1) // 2)
    bn = min(bn, n)
    if bn < n and bn >= 8:
        bn = (bn // 8) * 8   # sublane-aligned batch blocks -> clean (bn, 2C) tiles
    return int(bn)


@functools.partial(jax.jit, static_argnames=("eps",))
def _rln_forward(x, weight, bias, m1w, m1b, m2w, m2b, *, eps):
    N, C, H, W = x.shape
    HW = H * W
    k = _fold_factor(C, HW)
    CF, HWF = C * k, HW // k
    x3 = x.reshape(N, CF, HWF)          # free reshape: same row-major order

    # Packed constant parameter blocks (2 constant DMAs instead of 6).
    wb = jnp.stack([jnp.repeat(weight, k), jnp.repeat(bias, k)],
                   axis=0).reshape(2, CF, 1)                  # sublane-C layout
    meta = jnp.stack([m1w, m1b, m2w, m2b], axis=0)            # (4, C), lane-C layout

    isz = x.dtype.itemsize
    # Per-sample VMEM: double-buffered x + out blocks plus ~2 f32 temporaries.
    per_sample = CF * HWF * (2 * isz + 2 * isz + 8)
    block_n = _pick_block_n(N, per_sample)
    # TODO(synk): add a spatial (HW-tiled, two-pass) path for samples whose
    # whole (C, H*W) block exceeds the VMEM budget (large DehazeFormer
    # resolutions; tightest on v7x's 64 MiB VMEM) — with block_n == 1 this
    # kernel still needs one full sample resident.
    step_bytes = block_n * per_sample
    vmem_limit = int(min(48 * 1024 * 1024, max(8 * 1024 * 1024, 2 * step_bytes)))

    kernel = functools.partial(rln_kernel, eps=eps,
                               inv_count=1.0 / float(CF * HWF))
    out3, meta_out = pl.pallas_call(
        kernel,
        out_shape=(
            jax.ShapeDtypeStruct((N, CF, HWF), x.dtype),
            jax.ShapeDtypeStruct((N, 2 * C), jnp.float32),
        ),
        grid=(pl.cdiv(N, block_n),),
        in_specs=[
            pl.BlockSpec((block_n, CF, HWF), lambda i: (i, 0, 0)),
            pl.BlockSpec((2, CF, 1), lambda i: (0, 0, 0)),   # weight/bias (constant)
            pl.BlockSpec((4, C), lambda i: (0, 0)),          # meta1/meta2 (constant)
        ],
        out_specs=(
            pl.BlockSpec((block_n, CF, HWF), lambda i: (i, 0, 0)),
            pl.BlockSpec((block_n, 2 * C), lambda i: (i, 0)),
        ),
        compiler_params=pltpu.CompilerParams(
            dimension_semantics=("parallel",),
            vmem_limit_bytes=vmem_limit),
    )(x3, wb, meta)

    out = out3.reshape(N, C, H, W)
    rescale = meta_out[:, :C].reshape(N, C, 1, 1)
    rebias = meta_out[:, C:].reshape(N, C, 1, 1)
    return out, rescale, rebias


# ----------------------------------------------------------------------------
# Module-level wrapper (parameter setup + 5-D "context" reshape handling).
# ----------------------------------------------------------------------------
class RLNPallas:
    def __init__(self, dim, eps=1e-5, detach_grad=False, *, key=None):
        self.dim = dim
        self.eps = float(eps)
        # detach_grad only changes autograd (std.detach()/mean.detach());
        # the forward pass is identical, so nothing to do here.
        self.detach_grad = detach_grad
        if key is None:
            key = jax.random.PRNGKey(0)
        k1, k2 = jax.random.split(key)

        self.weight = jnp.ones((dim,), jnp.float32)           # (1, dim, 1, 1) in torch
        self.bias = jnp.zeros((dim,), jnp.float32)
        # meta1 = Conv2d(1, dim, 1): trunc_normal(std=0.02) weight, bias = 1
        self.meta1_w = jax.random.truncated_normal(
            k1, -2.0, 2.0, (dim,), jnp.float32) * 0.02
        self.meta1_b = jnp.ones((dim,), jnp.float32)
        # meta2 = Conv2d(1, dim, 1): trunc_normal(std=0.02) weight, bias = 0
        self.meta2_w = jax.random.truncated_normal(
            k2, -2.0, 2.0, (dim,), jnp.float32) * 0.02
        self.meta2_b = jnp.zeros((dim,), jnp.float32)

    def __call__(self, x):
        is_context = (x.ndim == 5)
        if is_context:
            B, S = x.shape[:2]
            x = x.reshape((B * S,) + x.shape[2:])
        out, rescale, rebias = _rln_forward(
            x, self.weight, self.bias,
            self.meta1_w, self.meta1_b, self.meta2_w, self.meta2_b,
            eps=self.eps)
        if is_context:
            out = out.reshape((B, S) + out.shape[1:])
            rescale = rescale.reshape((B, S) + rescale.shape[1:])
            rebias = rebias.reshape((B, S) + rebias.shape[1:])
        return out, rescale, rebias


# Pure-JAX reference (mirrors the PyTorch forward) for a correctness check.
def rln_reference(x, weight, bias, m1w, m1b, m2w, m2b, eps):
    mean = jnp.mean(x, axis=(1, 2, 3), keepdims=True)
    var = jnp.mean((x - mean) ** 2, axis=(1, 2, 3), keepdims=True)
    std = jnp.sqrt(var + eps)
    out = (x - mean) / std * weight.reshape(1, -1, 1, 1) + bias.reshape(1, -1, 1, 1)
    rescale = std * m1w.reshape(1, -1, 1, 1) + m1b.reshape(1, -1, 1, 1)
    rebias = mean * m2w.reshape(1, -1, 1, 1) + m2b.reshape(1, -1, 1, 1)
    return out, rescale, rebias


if __name__ == "__main__":
    B, C, H, W = 2, 4, 16, 16
    key = jax.random.PRNGKey(0)
    k_param, k_in = jax.random.split(key)

    module = RLNPallas(dim=C, eps=1e-5, key=k_param)
    x = jax.random.normal(k_in, (B, C, H, W), jnp.float32)

    out, rescale, rebias = module(x)
    jax.block_until_ready((out, rescale, rebias))

    assert out.shape == (B, C, H, W)
    assert rescale.shape == (B, C, 1, 1)
    assert rebias.shape == (B, C, 1, 1)

    ref_out, ref_rescale, ref_rebias = rln_reference(
        x, module.weight, module.bias,
        module.meta1_w, module.meta1_b, module.meta2_w, module.meta2_b, 1e-5)
    assert np.allclose(np.asarray(out), np.asarray(ref_out), rtol=1e-5, atol=1e-5)
    assert np.allclose(np.asarray(rescale), np.asarray(ref_rescale), rtol=1e-5, atol=1e-5)
    assert np.allclose(np.asarray(rebias), np.asarray(ref_rebias), rtol=1e-5, atol=1e-5)

    print("KERNEL_OK")
</pallas_src>

<mosaic_0001>
module attributes {stable_mosaic.version = 11 : i64} {
  func.func @rln_kernel(%arg0: i32, %arg1: memref<2x8x128xf32, #tpu.memory_space<vmem>>, %arg2: memref<2x8x1xf32, #tpu.memory_space<vmem>>, %arg3: memref<4x4xf32, #tpu.memory_space<vmem>>, %arg4: memref<2x8x128xf32, #tpu.memory_space<vmem>>, %arg5: memref<2x8xf32, #tpu.memory_space<vmem>>) attributes {dimension_semantics = [#tpu.dimension_semantics<parallel>], iteration_bounds = array<i64: 1>, scalar_prefetch = 0 : i64, scratch_operands = 0 : i64, tpu.core_type = #tpu.core_type<tc>, window_params = [{transform_indices = @transform_0, window_bounds = array<i64: 2, 8, 128>}, {pipeline_mode = #tpu.pipeline_mode<synchronous>, transform_indices = @transform_1, window_bounds = array<i64: 2, 8, 1>}, {pipeline_mode = #tpu.pipeline_mode<synchronous>, transform_indices = @transform_2, window_bounds = array<i64: 4, 4>}, {transform_indices = @transform_3, window_bounds = array<i64: 2, 8, 128>}, {transform_indices = @transform_4, window_bounds = array<i64: 2, 8>}]} {
    %c0 = arith.constant 0 : index
    %c0_0 = arith.constant 0 : index
    %c0_1 = arith.constant 0 : index
    %0 = vector.load %arg1[%c0, %c0_0, %c0_1] : memref<2x8x128xf32, #tpu.memory_space<vmem>>, vector<2x8x128xf32>
    %cst = arith.constant dense<0.000000e+00> : vector<2x8xf32>
    %1 = vector.multi_reduction <add>, %0, %cst [2] : vector<2x8x128xf32> to vector<2x8xf32>
    %2 = vector.shape_cast %1 : vector<2x8xf32> to vector<2x8x1xf32>
    %cst_2 = arith.constant dense<0.000000e+00> : vector<2x1xf32>
    %3 = vector.multi_reduction <add>, %2, %cst_2 [1] : vector<2x8x1xf32> to vector<2x1xf32>
    %4 = vector.shape_cast %3 : vector<2x1xf32> to vector<2x1x1xf32>
    %5 = arith.mulf %0, %0 : vector<2x8x128xf32>
    %cst_3 = arith.constant dense<0.000000e+00> : vector<2x8xf32>
    %6 = vector.multi_reduction <add>, %5, %cst_3 [2] : vector<2x8x128xf32> to vector<2x8xf32>
    %7 = vector.shape_cast %6 : vector<2x8xf32> to vector<2x8x1xf32>
    %cst_4 = arith.constant dense<0.000000e+00> : vector<2x1xf32>
    %8 = vector.multi_reduction <add>, %7, %cst_4 [1] : vector<2x8x1xf32> to vector<2x1xf32>
    %9 = vector.shape_cast %8 : vector<2x1xf32> to vector<2x1x1xf32>
    %cst_5 = arith.constant 9.765625E-4 : f32
    %10 = vector.broadcast %cst_5 : f32 to vector<2x1x1xf32>
    %11 = arith.mulf %4, %10 : vector<2x1x1xf32>
    %cst_6 = arith.constant 9.765625E-4 : f32
    %12 = vector.broadcast %cst_6 : f32 to vector<2x1x1xf32>
    %13 = arith.mulf %9, %12 : vector<2x1x1xf32>
    %14 = arith.mulf %11, %11 : vector<2x1x1xf32>
    %15 = arith.subf %13, %14 : vector<2x1x1xf32>
    %cst_7 = arith.constant 0.000000e+00 : f32
    %16 = vector.broadcast %cst_7 : f32 to vector<2x1x1xf32>
    %17 = arith.maximumf %15, %16 : vector<2x1x1xf32>
    %cst_8 = arith.constant 9.99999974E-6 : f32
    %18 = vector.broadcast %cst_8 : f32 to vector<2x1x1xf32>
    %19 = arith.addf %17, %18 : vector<2x1x1xf32>
    %20 = math.rsqrt %19 : vector<2x1x1xf32>
    %cst_9 = arith.constant 9.99999974E-6 : f32
    %21 = vector.broadcast %cst_9 : f32 to vector<2x1x1xf32>
    %22 = arith.addf %17, %21 : vector<2x1x1xf32>
    %23 = arith.mulf %22, %20 : vector<2x1x1xf32>
    %c0_10 = arith.constant 0 : index
    %c0_11 = arith.constant 0 : index
    %c0_12 = arith.constant 0 : index
    %24 = vector.load %arg2[%c0_10, %c0_11, %c0_12] : memref<2x8x1xf32, #tpu.memory_space<vmem>>, vector<1x8x1xf32>
    %c1 = arith.constant 1 : index
    %c0_13 = arith.constant 0 : index
    %c0_14 = arith.constant 0 : index
    %25 = vector.load %arg2[%c1, %c0_13, %c0_14] : memref<2x8x1xf32, #tpu.memory_space<vmem>>, vector<1x8x1xf32>
    %26 = vector.broadcast %20 : vector<2x1x1xf32> to vector<2x8x1xf32>
    %27 = vector.broadcast %24 : vector<1x8x1xf32> to vector<2x8x1xf32>
    %28 = arith.mulf %26, %27 : vector<2x8x1xf32>
    %29 = vector.broadcast %11 : vector<2x1x1xf32> to vector<2x8x1xf32>
    %30 = arith.mulf %29, %28 : vector<2x8x1xf32>
    %31 = vector.broadcast %25 : vector<1x8x1xf32> to vector<2x8x1xf32>
    %32 = arith.subf %31, %30 : vector<2x8x1xf32>
    %33 = vector.broadcast %28 : vector<2x8x1xf32> to vector<2x8x128xf32>
    %34 = arith.mulf %0, %33 : vector<2x8x128xf32>
    %35 = vector.broadcast %32 : vector<2x8x1xf32> to vector<2x8x128xf32>
    %36 = arith.addf %34, %35 : vector<2x8x128xf32>
    %c0_15 = arith.constant 0 : index
    %c0_16 = arith.constant 0 : index
    %c0_17 = arith.constant 0 : index
    %37 = vector.load %arg4[%c0_15, %c0_16, %c0_17] : memref<2x8x128xf32, #tpu.memory_space<vmem>>, vector<2x8x128xf32>
    tpu.vector_store %arg4[%c0_15, %c0_16, %c0_17], %36 {strides = array<i32>} : memref<2x8x128xf32, #tpu.memory_space<vmem>>, vector<2x8x128xf32>,
    %38 = vector.shape_cast %23 : vector<2x1x1xf32> to vector<2x1xf32>
    %39 = vector.shape_cast %11 : vector<2x1x1xf32> to vector<2x1xf32>
    %c0_18 = arith.constant 0 : index
    %c0_19 = arith.constant 0 : index
    %40 = vector.load %arg3[%c0_18, %c0_19] : memref<4x4xf32, #tpu.memory_space<vmem>>, vector<1x4xf32>
    %c1_20 = arith.constant 1 : index
    %c0_21 = arith.constant 0 : index
    %41 = vector.load %arg3[%c1_20, %c0_21] : memref<4x4xf32, #tpu.memory_space<vmem>>, vector<1x4xf32>
    %c2 = arith.constant 2 : index
    %c0_22 = arith.constant 0 : index
    %42 = vector.load %arg3[%c2, %c0_22] : memref<4x4xf32, #tpu.memory_space<vmem>>, vector<1x4xf32>
    %c3 = arith.constant 3 : index
    %c0_23 = arith.constant 0 : index
    %43 = vector.load %arg3[%c3, %c0_23] : memref<4x4xf32, #tpu.memory_space<vmem>>, vector<1x4xf32>
    %44 = vector.broadcast %38 : vector<2x1xf32> to vector<2x4xf32>
    %45 = vector.broadcast %40 : vector<1x4xf32> to vector<2x4xf32>
    %46 = arith.mulf %44, %45 : vector<2x4xf32>
    %47 = vector.broadcast %41 : vector<1x4xf32> to vector<2x4xf32>
    %48 = arith.addf %46, %47 : vector<2x4xf32>
    %49 = vector.broadcast %39 : vector<2x1xf32> to vector<2x4xf32>
    %50 = vector.broadcast %42 : vector<1x4xf32> to vector<2x4xf32>
    %51 = arith.mulf %49, %50 : vector<2x4xf32>
    %52 = vector.broadcast %43 : vector<1x4xf32> to vector<2x4xf32>
    %53 = arith.addf %51, %52 : vector<2x4xf32>
    %54 = tpu.concatenate %48, %53 in 1 : vector<2x4xf32>, vector<2x4xf32> -> vector<2x8xf32>
    %c0_24 = arith.constant 0 : index
    %c0_25 = arith.constant 0 : index
    %55 = vector.load %arg5[%c0_24, %c0_25] : memref<2x8xf32, #tpu.memory_space<vmem>>, vector<2x8xf32>
    tpu.vector_store %arg5[%c0_24, %c0_25], %54 {strides = array<i32>} : memref<2x8xf32, #tpu.memory_space<vmem>>, vector<2x8xf32>,
    return
  }
  func.func @transform_0(%arg0: i32) -> (i32, i32, i32) {
    %c0_i32 = arith.constant 0 : i32
    %c0_i32_0 = arith.constant 0 : i32
    %c0_i32_1 = arith.constant 0 : i32
    return %arg0, %c0_i32, %c0_i32_0 : i32, i32, i32
  }
  func.func @transform_1(%arg0: i32) -> (i32, i32, i32) {
    %c0_i32 = arith.constant 0 : i32
    %c0_i32_0 = arith.constant 0 : i32
    %c0_i32_1 = arith.constant 0 : i32
    %c0_i32_2 = arith.constant 0 : i32
    return %c0_i32, %c0_i32_0, %c0_i32_1 : i32, i32, i32
  }
  func.func @transform_2(%arg0: i32) -> (i32, i32) {
    %c0_i32 = arith.constant 0 : i32
    %c0_i32_0 = arith.constant 0 : i32
    %c0_i32_1 = arith.constant 0 : i32
    return %c0_i32, %c0_i32_0 : i32, i32
  }
  func.func @transform_3(%arg0: i32) -> (i32, i32, i32) {
    %c0_i32 = arith.constant 0 : i32
    %c0_i32_0 = arith.constant 0 : i32
    %c0_i32_1 = arith.constant 0 : i32
    return %arg0, %c0_i32, %c0_i32_0 : i32, i32, i32
  }
  func.func @transform_4(%arg0: i32) -> (i32, i32) {
    %c0_i32 = arith.constant 0 : i32
    %c0_i32_0 = arith.constant 0 : i32
    return %arg0, %c0_i32 : i32, i32
  }
}

</mosaic_0001>

<bundles_post_ra>
// kernel: _rln_forward.1
= control target key start
LH: loop header
LB: loop body
LE: loop exit
PB: predicated region body
PF: predicated region fallthrough
CT: control target
= control target key end

     0   :  { %v169_v4 = vmov 0   ;;  %vm134_vm0 = vcmask 1041409   ;;  %vm144_vm1 = vcmask 31744   ;;  %vm146_vm2 = vcmask 58368   ;;  %s241_s0 = inlined_call_operand.vmem [shape: f32[2,8,128], index: 0, kind: input, shape index: {}]   ;;  %s242_s1 = inlined_call_operand.vmem [shape: f32[2,8,1], index: 1, kind: input, shape index: {}]   ;;  %s243_s2 = inlined_call_operand.vmem [shape: f32[4,4], index: 2, kind: input, shape index: {}]   ;;  %s244_s3 = inlined_call_operand.vmem [shape: f32[2,8,128], index: 3, kind: output, shape index: {0}]   ;;  %s245_s4 = inlined_call_operand.vmem [shape: f32[2,8], index: 4, kind: output, shape index: {1}]  }
   0x1   :  { %v199_v0 = vld [vmem:[%s241_s0] sm:$0xff]  ;;  %v204_v1 = vld [vmem:[%s241_s0 + $0x8] sm:$0xff]  ;;  %163 = vset.pattern.permute.xlu0 %v169_v4  ;;  %164 = vset.pattern.permute.xlu1 %v169_v4 }
   0x2   :  { %18 = vadd.xlane.f32.xlu0 %v199_v0  ;;  %v34_v2 = vmul.f32 %v199_v0, %v199_v0  ;;  %v35_v3 = vmul.f32 %v204_v1, %v204_v1  ;;  %v68_v45 = vld [vmem:[%s242_s1] sm:$0xff]  ;;  %v156_v58 = vld [vmem:[%s242_s1 + $0x8] sm:$0xff]  ;;  %s170_s1 = smov 4  }
   0x3   :  { %v157_v47 = vld [vmem:[%s243_s2] ss:$0 sm:$0xff]  ;;  %v158_v50 = vld [vmem:[%s243_s2 + $0x1] ss:$0 sm:$0xff]  ;;  %v159_v56 = vld [vmem:[%s243_s2 + $0x2] ss:$0 sm:$0xff] }
   0x4   :  { %36 = vadd.xlane.f32.xlu1 %v34_v2  ;;  %v160_v63 = vld [vmem:[%s243_s2 + $0x3] ss:$0 sm:$0xff] }
   0x6   :  { %20 = vadd.xlane.f32.xlu0 %v204_v1 }
   0x8   :  { %38 = vadd.xlane.f32.xlu1 %v35_v3 }
  0x8b   :  { %v19_v5 = vpop.xlane.xlu0 %18 }
  0x8c   :  { %v22_v6 = vrot.slane %v19_v5, 4 }
  0x8d   :  { %v37_v7 = vpop.xlane.xlu1 %36 }
  0x8e   :  { %v23_v8 = vadd.f32 %v22_v6, %v19_v5  ;;  %v40_v9 = vrot.slane %v37_v7, 4 }
  0x8f   :  { %v21_v10 = vpop.xlane.xlu0 %20 }
  0x90   :  { %v24_v11 = vrot.slane %v23_v8, 2  ;;  %v41_v12 = vadd.f32 %v40_v9, %v37_v7  ;;  %v28_v13 = vrot.slane %v21_v10, 4 }
  0x91   :  { %v39_v14 = vpop.xlane.xlu1 %38 }
  0x92   :  { %v25_v15 = vadd.f32 %v24_v11, %v23_v8  ;;  %v42_v16 = vrot.slane %v41_v12, 2  ;;  %v29_v17 = vadd.f32 %v28_v13, %v21_v10  ;;  %v46_v18 = vrot.slane %v39_v14, 4 }
  0x94   :  { %v26_v19 = vrot.slane %v25_v15, 1  ;;  %v43_v20 = vadd.f32 %v42_v16, %v41_v12  ;;  %v30_v21 = vrot.slane %v29_v17, 2  ;;  %v47_v22 = vadd.f32 %v46_v18, %v39_v14 }
  0x96   :  { %v27_v23 = vadd.f32 %v26_v19, %v25_v15  ;;  %v44_v24 = vrot.slane %v43_v20, 1  ;;  %v31_v25 = vadd.f32 %v30_v21, %v29_v17  ;;  %v48_v26 = vrot.slane %v47_v22, 2 }
  0x98   :  { %v52_v27 = vmul.f32 0.0009765625, %v27_v23  ;;  %v45_v28 = vadd.f32 %v44_v24, %v43_v20  ;;  %v32_v29 = vrot.slane %v31_v25, 1  ;;  %v49_v30 = vadd.f32 %v48_v26, %v47_v22 }
  0x9a   :  { %v56_v31 = vmul.f32 %v52_v27, %v52_v27  ;;  %v54_v32 = vmul.f32 0.0009765625, %v45_v28  ;;  %v33_v33 = vadd.f32 %v32_v29, %v31_v25  ;;  %v50_v34 = vrot.slane %v49_v30, 1 }
  0x9b   :  { %v123_v5 = vmul.f32 %v159_v56, %v52_v27 }
  0x9c   :  { %v58_v35 = vsub.f32 %v54_v32, %v56_v31  ;;  %v53_v36 = vmul.f32 0.0009765625, %v33_v33  ;;  %v51_v37 = vadd.f32 %v50_v34, %v49_v30 }
  0x9d   :  { %v129_v9 = vadd.f32 %v160_v63, %v123_v5 }
  0x9e   :  { %v60_v38 = vmax.f32 %v58_v35, 0.0  ;;  %v57_v39 = vmul.f32 %v53_v36, %v53_v36  ;;  %v55_v40 = vmul.f32 0.0009765625, %v51_v37  ;;  %v124_v59 = vmul.f32 %v159_v56, %v53_v36 }
  0xa0   :  { %v62_v41 = vadd.f32 1e-05, %v60_v38  ;;  %v59_v42 = vsub.f32 %v55_v40, %v57_v39  ;;  %v130_v3 = vadd.f32 %v160_v63, %v124_v59 }
  0xa2   :  { %165 = vrsqrt.f32 %v62_v41  ;;  %v61_v43 = vmax.f32 %v59_v42, 0.0  ;;  %v139_v8 = vrot.slane %v130_v3, 7 }
  0xa4   :  { %v63_v44 = vadd.f32 1e-05, %v61_v43  ;;  %v140_v10 = vsel %vm134_vm0, %v139_v8, %v129_v9 }
  0xa6   :  { %167 = vrsqrt.f32 %v63_v44 }
  0xaf   :  { %v166_v46 = vpop.eup %165 }
  0xb0   :  { %v66_v48 = vmul.f32 %v166_v46, %v62_v41  ;;  %v71_v49 = vmul.f32 %v166_v46, %v68_v45 }
  0xb2   :  { %79 = vperm.xlu0 %163, %v71_v49   ;;  %v111_v51 = vmul.f32 %v157_v47, %v66_v48  ;;  %v73_v55 = vmul.f32 %v71_v49, %v52_v27 }
  0xb3   :  { %v168_v52 = vpop.eup %167 }
  0xb4   :  { %v67_v53 = vmul.f32 %v168_v52, %v63_v44  ;;  %v72_v54 = vmul.f32 %v168_v52, %v68_v45  ;;  %v117_v57 = vadd.f32 %v158_v50, %v111_v51  ;;  %v75_v61 = vsub.f32 %v156_v58, %v73_v55 }
  0xb6   :  { %84 = vperm.xlu1 %164, %v72_v54   ;;  %v112_v60 = vmul.f32 %v157_v47, %v67_v53  ;;  %v74_v62 = vmul.f32 %v72_v54, %v53_v36 }
  0xb8   :  { %v118_v2 = vadd.f32 %v158_v50, %v112_v60  ;;  %v76_v6 = vsub.f32 %v156_v58, %v74_v62 }
  0xba   :  { %91 = vperm.xlu1 %164, %v75_v61   ;;  %v133_v4 = vrot.slane %v118_v2, 7 }
  0xbc   :  { %v135_v7 = vsel %vm134_vm0, %v133_v4, %v117_v57 }
  0xbe   :  { %96 = vperm.xlu1 %164, %v76_v6  }
  0xc2   :  { %141 = vrot.lane.b32.xlu1 %v140_v10, %s170_s1 }
 0x12d   :  { %v80_v11 = vpop.permute.xlu0 %79 }
 0x12e   :  { %v87_v13 = vmul.f32 %v80_v11, %v199_v0 }
 0x131   :  { %v85_v12 = vpop.permute.xlu1 %84 }
 0x132   :  { %v88_v16 = vmul.f32 %v85_v12, %v204_v1 }
 0x135   :  { %v92_v14 = vpop.permute.xlu1 %91 }
 0x136   :  { %v99_v15 = vadd.f32 %v92_v14, %v87_v13 }
 0x138   :  { %101 = vst [vmem:[%s244_s3] sm:$0xff] %v99_v15 }
 0x139   :  { %v97_v17 = vpop.permute.xlu1 %96 }
 0x13a   :  { %v100_v18 = vadd.f32 %v97_v17, %v88_v16 }
 0x13c   :  { %102 = vst [vmem:[%s244_s3 + $0x8] sm:$0xff] %v100_v18 }
 0x13d   :  { %v142_v19 = vpop.permute.xlu1 %141 }
 0x13e   :  { %v145_v20 = vsel %vm144_vm1, %v135_v7, %v142_v19 }
 0x13f   :  { %147 = vst.msk [vmem:[%s245_s4] sm:$0x3] %vm146_vm2, %v145_v20 }

</bundles_post_ra>
